<compile_context>
chip_gen: v6e
topology: v6e:2x2x1
jax: 0.10.0
libtpu: 0.0.40
codegen_flags: <defaults>
</compile_context>

<pallas_src>
import functools

import jax
import jax.numpy as jnp
from jax.experimental import pallas as pl
from jax.experimental.pallas import tpu as pltpu


def _ceil_div(a, b):
    return -(-a // b)


def _check_pool_args(K, S, D, P):
    if K <= 0 or S <= 0 or D <= 0 or P < 0:
        raise ValueError("kernel_size/stride/dilation must be > 0, padding >= 0")
    if P > K // 2:
        raise ValueError(
            f"pad should be at most half of kernel size, got padding={P}, "
            f"kernel_size={K}")


def _maxpool1d_out_len(l_in, k, s, d, p, ceil_mode):
    eff_k = d * (k - 1) + 1
    num = l_in + 2 * p - eff_k
    if num < 0:
        raise ValueError(
            f"pooled length {l_in} too small for kernel_size={k}, "
            f"dilation={d}, padding={p}")
    if ceil_mode:
        l_out = _ceil_div(num, s) + 1
        # torch rule: windows may not start in the right padding region.
        if (l_out - 1) * s >= l_in + p:
            l_out -= 1
    else:
        l_out = num // s + 1
    return l_out


def _cpool_sublane_kernel(xr_ref, xi_ref, or_ref, oi_ref, *,
                          kernel_size, stride, dilation, pad_left,
                          l_in, l_out):
    """Max-pool along the sublane axis (dim 1) of (bb, L, tf) blocks.

    The output refs double as accumulators: each tap is max-accumulated into
    its valid output sub-range (no -inf concatenations, no extra VMEM temps).
    """
    K, S, D, P = kernel_size, stride, dilation, pad_left
    dtype = or_ref.dtype
    if jnp.issubdtype(dtype, jnp.floating):
        fill = -jnp.inf
    else:
        fill = int(jnp.iinfo(dtype).min)

    # Trace-time tap plan (all Python ints).
    taps = []
    for k in range(K):
        # Output j reads input position j*S + k*D - P for tap k.
        j_lo = max(0, _ceil_div(P - k * D, S))
        j_hi = min(l_out, (l_in - 1 + P - k * D) // S + 1)
        if j_hi <= j_lo:
            continue  # this tap only ever hits padding
        start = j_lo * S + k * D - P
        taps.append((j_lo, j_hi, start))

    all_full = bool(taps) and all(lo == 0 and hi == l_out for lo, hi, _ in taps)

    if not all_full:
        # Rows missed by some taps start at MaxPool1d's implicit -inf padding.
        or_ref[...] = jnp.full(or_ref.shape, fill, dtype=dtype)
        oi_ref[...] = jnp.full(oi_ref.shape, fill, dtype=dtype)

    for t, (j_lo, j_hi, start) in enumerate(taps):
        count = j_hi - j_lo
        idx = pl.ds(start, count) if S == 1 else pl.ds(start, count, stride=S)
        cr = xr_ref[:, idx, :]
        ci = xi_ref[:, idx, :]
        if all_full and t == 0:
            or_ref[...] = cr
            oi_ref[...] = ci
        else:
            osl = (slice(None), slice(j_lo, j_hi), slice(None))
            or_ref[osl] = jnp.maximum(or_ref[osl], cr)
            oi_ref[osl] = jnp.maximum(oi_ref[osl], ci)


def _pool_core(xr3, xi3, K, S, D, P, ceil_mode):
    """Pool axis 1 of (B, L, F) real/imag arrays. Returns (B, L_out, F) pair."""
    assert xr3.shape == xi3.shape and xr3.dtype == xi3.dtype
    B, L_in, F = xr3.shape
    dtype = xr3.dtype
    itemsize = jnp.dtype(dtype).itemsize
    L_out = _maxpool1d_out_len(L_in, K, S, D, P, ceil_mode)

    # Lane tile: full F when modest (legal since it equals the array dim),
    # otherwise a 128-multiple with a ragged (masked) last block.
    tf = F if F <= 512 else 512

    # Batch tile from a byte budget (~2 MiB per input block), ragged last block.
    target_in_block_bytes = 2 * 1024 * 1024
    bb = max(1, min(B, target_in_block_bytes // max(1, L_in * tf * itemsize)))
    # v7x megacore: keep >= 2 blocks along a "parallel" axis when possible.
    if F <= tf and B > 1:
        bb = min(bb, _ceil_div(B, 2))

    def _resident_bytes(bb_, tf_):
        # 2 streams (re+im) x double buffer x (input block + output block).
        return 2 * 2 * bb_ * tf_ * (L_in + L_out) * itemsize

    # TODO(synk): add pooled-axis (L) tiling with a (K-1)*D halo for extremely
    # long pooled lengths; until then shrink the lane tile to bound VMEM.
    vmem_budget = 24 * 1024 * 1024
    while bb == 1 and tf > 128 and _resident_bytes(bb, tf) > vmem_budget:
        new_tf = ((tf // 2) // 128) * 128
        if new_tf < 128:
            break
        tf = new_tf

    resident = _resident_bytes(bb, tf)
    vmem_limit = int(min(48 * 1024 * 1024, max(16 * 1024 * 1024, 2 * resident)))

    grid = (pl.cdiv(B, bb), pl.cdiv(F, tf))

    kernel = functools.partial(
        _cpool_sublane_kernel, kernel_size=K, stride=S, dilation=D,
        pad_left=P, l_in=L_in, l_out=L_out)

    cost = pl.CostEstimate(
        flops=int(2 * B * L_out * F * max(K - 1, 1)),
        transcendentals=0,
        bytes_accessed=int((2 * B * L_in * F + 2 * B * L_out * F) * itemsize))

    out_r, out_i = pl.pallas_call(
        kernel,
        out_shape=(jax.ShapeDtypeStruct((B, L_out, F), dtype),
                   jax.ShapeDtypeStruct((B, L_out, F), dtype)),
        grid_spec=pltpu.PrefetchScalarGridSpec(
            num_scalar_prefetch=0,
            grid=grid,
            in_specs=[pl.BlockSpec((bb, L_in, tf), lambda i, j: (i, 0, j)),
                      pl.BlockSpec((bb, L_in, tf), lambda i, j: (i, 0, j))],
            out_specs=[pl.BlockSpec((bb, L_out, tf), lambda i, j: (i, 0, j)),
                       pl.BlockSpec((bb, L_out, tf), lambda i, j: (i, 0, j))],
        ),
        compiler_params=pltpu.CompilerParams(
            dimension_semantics=("parallel", "parallel"),
            vmem_limit_bytes=vmem_limit),
        cost_estimate=cost,
    )(xr3, xi3)
    return out_r, out_i


def complex_max_pool1d(input_r, input_i, kernel_size, stride=None, padding=0,
                       dilation=1, ceil_mode=False, return_indices=False):
    """ComplexMaxPool1d equivalent: (B, C, L) inputs, pools the last axis."""
    if return_indices:
        # TODO(synk): return_indices (argmax index output) not implemented.
        raise NotImplementedError("return_indices=True is not supported")
    if input_r.shape != input_i.shape or input_r.dtype != input_i.dtype:
        raise ValueError("real/imag parts must have identical shape and dtype")
    K = int(kernel_size)
    S = K if stride is None else int(stride)
    D = int(dilation)
    P = int(padding)
    _check_pool_args(K, S, D, P)
    B, C, L = input_r.shape
    if C >= 128:
        # Lane-dense already: pooled axis L on sublanes, C on lanes.
        xr3 = jnp.swapaxes(input_r, 1, 2)
        xi3 = jnp.swapaxes(input_i, 1, 2)
        or3, oi3 = _pool_core(xr3, xi3, K, S, D, P, bool(ceil_mode))
        return jnp.swapaxes(or3, 1, 2), jnp.swapaxes(oi3, 1, 2)
    # Lane-widening repack: lanes = B*C.
    xr3 = jnp.transpose(input_r, (2, 0, 1)).reshape(1, L, B * C)
    xi3 = jnp.transpose(input_i, (2, 0, 1)).reshape(1, L, B * C)
    or3, oi3 = _pool_core(xr3, xi3, K, S, D, P, bool(ceil_mode))
    L_out = or3.shape[1]
    out_r = jnp.transpose(or3.reshape(L_out, B, C), (1, 2, 0))
    out_i = jnp.transpose(oi3.reshape(L_out, B, C), (1, 2, 0))
    return out_r, out_i


def complex_max_pool1(Xr, Xi, axis, kernel_size, stride=None, padding=0,
                      dilation=1, ceil_mode=False, return_indices=False):
    """ComplexMaxPool1 equivalent: NCHW inputs, pools along H (axis=2) or W (axis=3)."""
    if return_indices:
        # TODO(synk): return_indices (argmax index output) not implemented.
        raise NotImplementedError("return_indices=True is not supported")
    if Xr.ndim != 4:
        raise ValueError("expected NCHW inputs")
    if Xr.shape != Xi.shape or Xr.dtype != Xi.dtype:
        raise ValueError("real/imag parts must have identical shape and dtype")
    if axis not in (2, 3):
        raise ValueError("Only support 2 or 3 for N-C-H-W")
    K = int(kernel_size)
    S = K if stride is None else int(stride)
    D = int(dilation)
    P = int(padding)
    _check_pool_args(K, S, D, P)
    N, C, H, W = Xr.shape
    ceil_mode = bool(ceil_mode)

    if axis == 2:
        if W >= 128:
            # Pool along H with W already lane-dense: (N,C,H,W) -> (N*C,H,W)
            # is a FREE reshape, zero transposes / extra HBM passes.
            xr3 = Xr.reshape(N * C, H, W)
            xi3 = Xi.reshape(N * C, H, W)
            or3, oi3 = _pool_core(xr3, xi3, K, S, D, P, ceil_mode)
            H_out = or3.shape[1]
            return (or3.reshape(N, C, H_out, W), oi3.reshape(N, C, H_out, W))
        # Narrow W: lane-widening repack -> (N, H, C*W) so lanes are C*W.
        xr3 = jnp.transpose(Xr, (0, 2, 1, 3)).reshape(N, H, C * W)
        xi3 = jnp.transpose(Xi, (0, 2, 1, 3)).reshape(N, H, C * W)
        or3, oi3 = _pool_core(xr3, xi3, K, S, D, P, ceil_mode)
        H_out = or3.shape[1]
        out_r = jnp.transpose(or3.reshape(N, H_out, C, W), (0, 2, 1, 3))
        out_i = jnp.transpose(oi3.reshape(N, H_out, C, W), (0, 2, 1, 3))
        return out_r, out_i
    else:
        # Pool along W: the required transpose is folded into a lane-widening
        # repack -> (N, W, C*H): pooled axis W on sublanes, lanes = C*H.
        xr3 = jnp.transpose(Xr, (0, 3, 1, 2)).reshape(N, W, C * H)
        xi3 = jnp.transpose(Xi, (0, 3, 1, 2)).reshape(N, W, C * H)
        or3, oi3 = _pool_core(xr3, xi3, K, S, D, P, ceil_mode)
        W_out = or3.shape[1]
        out_r = jnp.transpose(or3.reshape(N, W_out, C, H), (0, 2, 3, 1))
        out_i = jnp.transpose(oi3.reshape(N, W_out, C, H), (0, 2, 3, 1))
        return out_r, out_i


class ComplexMaxPool1d:
    """JAX/Pallas port of torchlib ComplexMaxPool1d ((B, C, L) inputs)."""

    def __init__(self, kernel_size, stride=None, padding=0, dilation=1,
                 return_indices=False, ceil_mode=False):
        self.kernel_size = kernel_size
        self.stride = stride
        self.padding = padding
        self.dilation = dilation
        self.ceil_mode = ceil_mode
        self.return_indices = return_indices

    def __call__(self, input_r, input_i):
        return complex_max_pool1d(input_r, input_i,
                                  kernel_size=self.kernel_size,
                                  stride=self.stride, padding=self.padding,
                                  dilation=self.dilation,
                                  ceil_mode=self.ceil_mode,
                                  return_indices=self.return_indices)


class ComplexMaxPool1:
    """JAX/Pallas port of torchlib ComplexMaxPool1 (NCHW inputs, pool H or W)."""

    def __init__(self, axis, kernel_size, stride=None, padding=0, dilation=1,
                 return_indices=False, ceil_mode=False):
        if axis not in (2, 3):
            raise ValueError("Only support 2 or 3 for N-C-H-W")
        self.axis = axis
        self.kernel_size = kernel_size
        self.stride = stride
        self.padding = padding
        self.dilation = dilation
        self.ceil_mode = ceil_mode
        self.return_indices = return_indices

    def __call__(self, Xr, Xi):
        return complex_max_pool1(Xr, Xi, axis=self.axis,
                                 kernel_size=self.kernel_size,
                                 stride=self.stride, padding=self.padding,
                                 dilation=self.dilation,
                                 ceil_mode=self.ceil_mode,
                                 return_indices=self.return_indices)


def _ref_maxpool1d_last(x, K, S, D, P, ceil_mode):
    """Pure-JAX reference: MaxPool1d along the last axis."""
    L = x.shape[-1]
    L_out = _maxpool1d_out_len(L, K, S, D, P, ceil_mode)
    neg = -jnp.inf if jnp.issubdtype(x.dtype, jnp.floating) else jnp.iinfo(x.dtype).min
    span = (L_out - 1) * S + (K - 1) * D + 1
    pad_r = max(0, span - (L + P))
    xp = jnp.pad(x, [(0, 0)] * (x.ndim - 1) + [(P, pad_r)], constant_values=neg)
    out = None
    for k in range(K):
        tap = xp[..., k * D: k * D + (L_out - 1) * S + 1: S]
        out = tap if out is None else jnp.maximum(out, tap)
    return out


if __name__ == "__main__":
    key = jax.random.PRNGKey(0)
    kr, ki = jax.random.split(key)
    x_r = jax.random.normal(kr, (2, 4, 16, 16), dtype=jnp.float32)
    x_i = jax.random.normal(ki, (2, 4, 16, 16), dtype=jnp.float32)

    # Case 1: pool along W (axis=3), kernel_size=2 (stride defaults to 2).
    mod_w = ComplexMaxPool1(axis=3, kernel_size=2)
    out_r, out_i = mod_w(x_r, x_i)
    jax.block_until_ready((out_r, out_i))
    ref_r = _ref_maxpool1d_last(x_r, 2, 2, 1, 0, False)
    ref_i = _ref_maxpool1d_last(x_i, 2, 2, 1, 0, False)
    assert out_r.shape == (2, 4, 16, 8) and out_i.shape == (2, 4, 16, 8)
    assert jnp.allclose(out_r, ref_r) and jnp.allclose(out_i, ref_i)

    # Case 2: pool along H (axis=2), kernel_size=3, stride=2 (overlapping windows).
    mod_h = ComplexMaxPool1(axis=2, kernel_size=3, stride=2)
    out_r2, out_i2 = mod_h(x_r, x_i)
    jax.block_until_ready((out_r2, out_i2))
    ref_r2 = jnp.swapaxes(
        _ref_maxpool1d_last(jnp.swapaxes(x_r, 2, 3), 3, 2, 1, 0, False), 2, 3)
    ref_i2 = jnp.swapaxes(
        _ref_maxpool1d_last(jnp.swapaxes(x_i, 2, 3), 3, 2, 1, 0, False), 2, 3)
    assert out_r2.shape == (2, 4, 7, 16) and out_i2.shape == (2, 4, 7, 16)
    assert jnp.allclose(out_r2, ref_r2) and jnp.allclose(out_i2, ref_i2)

    # Case 3: padding + ceil_mode (exercises the partial-tap / -inf init path).
    mod_p = ComplexMaxPool1(axis=3, kernel_size=3, stride=2, padding=1,
                            ceil_mode=True)
    out_r3, out_i3 = mod_p(x_r, x_i)
    jax.block_until_ready((out_r3, out_i3))
    ref_r3 = _ref_maxpool1d_last(x_r, 3, 2, 1, 1, True)
    ref_i3 = _ref_maxpool1d_last(x_i, 3, 2, 1, 1, True)
    assert out_r3.shape == ref_r3.shape == (2, 4, 16, 9)
    assert jnp.allclose(out_r3, ref_r3) and jnp.allclose(out_i3, ref_i3)

    # Case 4: ComplexMaxPool1d on (B, C, L) inputs.
    y_r = jax.random.normal(kr, (2, 4, 16), dtype=jnp.float32)
    y_i = jax.random.normal(ki, (2, 4, 16), dtype=jnp.float32)
    mod_1d = ComplexMaxPool1d(kernel_size=2)
    out_r4, out_i4 = mod_1d(y_r, y_i)
    jax.block_until_ready((out_r4, out_i4))
    ref_r4 = _ref_maxpool1d_last(y_r, 2, 2, 1, 0, False)
    ref_i4 = _ref_maxpool1d_last(y_i, 2, 2, 1, 0, False)
    assert out_r4.shape == (2, 4, 8) and out_i4.shape == (2, 4, 8)
    assert jnp.allclose(out_r4, ref_r4) and jnp.allclose(out_i4, ref_i4)

    print("KERNEL_OK")
</pallas_src>

<mosaic_0001>
module attributes {stable_mosaic.version = 11 : i64} {
  func.func @_cpool_sublane_kernel(%arg0: i32, %arg1: i32, %arg2: memref<1x16x64xf32, #tpu.memory_space<vmem>>, %arg3: memref<1x16x64xf32, #tpu.memory_space<vmem>>, %arg4: memref<1x8x64xf32, #tpu.memory_space<vmem>>, %arg5: memref<1x8x64xf32, #tpu.memory_space<vmem>>) attributes {dimension_semantics = [#tpu.dimension_semantics<parallel>, #tpu.dimension_semantics<parallel>], iteration_bounds = array<i64: 2, 1>, scalar_prefetch = 0 : i64, scratch_operands = 0 : i64, tpu.core_type = #tpu.core_type<tc>, window_params = [{transform_indices = @transform_0, window_bounds = array<i64: 1, 16, 64>}, {transform_indices = @transform_1, window_bounds = array<i64: 1, 16, 64>}, {transform_indices = @transform_2, window_bounds = array<i64: 1, 8, 64>}, {transform_indices = @transform_3, window_bounds = array<i64: 1, 8, 64>}]} {
    %c0 = arith.constant 0 : index
    %c0_0 = arith.constant 0 : index
    %c0_1 = arith.constant 0 : index
    %0 = tpu.strided_load %arg2[%c0, %c0_0, %c0_1] {strides = array<i32: 1, 2, 1>} : memref<1x16x64xf32, #tpu.memory_space<vmem>>, vector<1x8x64xf32>
    %c0_2 = arith.constant 0 : index
    %c0_3 = arith.constant 0 : index
    %c0_4 = arith.constant 0 : index
    %1 = tpu.strided_load %arg3[%c0_2, %c0_3, %c0_4] {strides = array<i32: 1, 2, 1>} : memref<1x16x64xf32, #tpu.memory_space<vmem>>, vector<1x8x64xf32>
    %c0_5 = arith.constant 0 : index
    %c0_6 = arith.constant 0 : index
    %c0_7 = arith.constant 0 : index
    %2 = vector.load %arg4[%c0_5, %c0_6, %c0_7] : memref<1x8x64xf32, #tpu.memory_space<vmem>>, vector<1x8x64xf32>
    tpu.vector_store %arg4[%c0_5, %c0_6, %c0_7], %0 {strides = array<i32>} : memref<1x8x64xf32, #tpu.memory_space<vmem>>, vector<1x8x64xf32>,
    %c0_8 = arith.constant 0 : index
    %c0_9 = arith.constant 0 : index
    %c0_10 = arith.constant 0 : index
    %3 = vector.load %arg5[%c0_8, %c0_9, %c0_10] : memref<1x8x64xf32, #tpu.memory_space<vmem>>, vector<1x8x64xf32>
    tpu.vector_store %arg5[%c0_8, %c0_9, %c0_10], %1 {strides = array<i32>} : memref<1x8x64xf32, #tpu.memory_space<vmem>>, vector<1x8x64xf32>,
    %c0_11 = arith.constant 0 : index
    %c1 = arith.constant 1 : index
    %c0_12 = arith.constant 0 : index
    %4 = tpu.strided_load %arg2[%c0_11, %c1, %c0_12] {strides = array<i32: 1, 2, 1>} : memref<1x16x64xf32, #tpu.memory_space<vmem>>, vector<1x8x64xf32>
    %c0_13 = arith.constant 0 : index
    %c1_14 = arith.constant 1 : index
    %c0_15 = arith.constant 0 : index
    %5 = tpu.strided_load %arg3[%c0_13, %c1_14, %c0_15] {strides = array<i32: 1, 2, 1>} : memref<1x16x64xf32, #tpu.memory_space<vmem>>, vector<1x8x64xf32>
    %c0_16 = arith.constant 0 : index
    %c0_17 = arith.constant 0 : index
    %c0_18 = arith.constant 0 : index
    %6 = vector.load %arg4[%c0_16, %c0_17, %c0_18] : memref<1x8x64xf32, #tpu.memory_space<vmem>>, vector<1x8x64xf32>
    %7 = arith.maximumf %6, %4 : vector<1x8x64xf32>
    %c0_19 = arith.constant 0 : index
    %c0_20 = arith.constant 0 : index
    %c0_21 = arith.constant 0 : index
    %8 = vector.load %arg4[%c0_19, %c0_20, %c0_21] : memref<1x8x64xf32, #tpu.memory_space<vmem>>, vector<1x8x64xf32>
    tpu.vector_store %arg4[%c0_19, %c0_20, %c0_21], %7 {strides = array<i32>} : memref<1x8x64xf32, #tpu.memory_space<vmem>>, vector<1x8x64xf32>,
    %c0_22 = arith.constant 0 : index
    %c0_23 = arith.constant 0 : index
    %c0_24 = arith.constant 0 : index
    %9 = vector.load %arg5[%c0_22, %c0_23, %c0_24] : memref<1x8x64xf32, #tpu.memory_space<vmem>>, vector<1x8x64xf32>
    %10 = arith.maximumf %9, %5 : vector<1x8x64xf32>
    %c0_25 = arith.constant 0 : index
    %c0_26 = arith.constant 0 : index
    %c0_27 = arith.constant 0 : index
    %11 = vector.load %arg5[%c0_25, %c0_26, %c0_27] : memref<1x8x64xf32, #tpu.memory_space<vmem>>, vector<1x8x64xf32>
    tpu.vector_store %arg5[%c0_25, %c0_26, %c0_27], %10 {strides = array<i32>} : memref<1x8x64xf32, #tpu.memory_space<vmem>>, vector<1x8x64xf32>,
    return
  }
  func.func @transform_0(%arg0: i32, %arg1: i32) -> (i32, i32, i32) {
    %c0_i32 = arith.constant 0 : i32
    %c0_i32_0 = arith.constant 0 : i32
    return %arg0, %c0_i32, %arg1 : i32, i32, i32
  }
  func.func @transform_1(%arg0: i32, %arg1: i32) -> (i32, i32, i32) {
    %c0_i32 = arith.constant 0 : i32
    %c0_i32_0 = arith.constant 0 : i32
    return %arg0, %c0_i32, %arg1 : i32, i32, i32
  }
  func.func @transform_2(%arg0: i32, %arg1: i32) -> (i32, i32, i32) {
    %c0_i32 = arith.constant 0 : i32
    %c0_i32_0 = arith.constant 0 : i32
    return %arg0, %c0_i32, %arg1 : i32, i32, i32
  }
  func.func @transform_3(%arg0: i32, %arg1: i32) -> (i32, i32, i32) {
    %c0_i32 = arith.constant 0 : i32
    %c0_i32_0 = arith.constant 0 : i32
    return %arg0, %c0_i32, %arg1 : i32, i32, i32
  }
}

</mosaic_0001>

<bundles_post_ra>
// kernel: tpu_custom_call.1
= control target key start
LH: loop header
LB: loop body
LE: loop exit
PB: predicated region body
PF: predicated region fallthrough
CT: control target
= control target key end

     0   :  { %s959_s0 = inlined_call_operand.hbm [shape: f32[2,16,64], index: 0, kind: input, shape index: {}]   ;;  %s960_s1 = inlined_call_operand.hbm [shape: f32[2,16,64], index: 1, kind: input, shape index: {}]   ;;  %s961_s2 = inlined_call_operand.hbm [shape: f32[2,8,64], index: 2, kind: output, shape index: {0}]   ;;  %s962_s3 = inlined_call_operand.hbm [shape: f32[2,8,64], index: 3, kind: output, shape index: {1}]  }
   0x1   :  { %963 = sst [smem:[#allocation14_spill]] %s959_s0 }
   0x2   :  { %9 = vsyncpa [#allocation3], 0 }
   0x3   :  { %11 = vsyncpa [#allocation3 + $0x1], 0 }
   0x4   :  { %12 = vsyncpa [#allocation6], 0 }
   0x5   :  { %14 = vsyncpa [#allocation6 + $0x1], 0 }
   0x6   :  { %15 = vsyncpa [#allocation4], 0 }
   0x7   :  { %17 = vsyncpa [#allocation4 + $0x1], 0 }
   0x8   :  { %18 = vsyncpa [#allocation9], 0 }
   0x9   :  { %20 = vsyncpa [#allocation9 + $0x1], 0  ;;  %s747_s12 = smov 0   ;;  %s749_s13 = smov 0  }
   0xa   :  { %s751_s14 = smov 0   ;;  %s753_s15 = smov 0  }
   0xb   :  { %s755_s16 = smov 0   ;;  %s757_s17 = smov 0  }
   0xc LB: > { %s450_s18 = sadd.s32 4294967295, %s719_s17   ;;  %s451_s19 = sadd.s32 4294967294, %s719_s17   ;;  %s719_s17 = sphi %s757_s17, %s26_s17   ;;  %s715_s16 = sphi %s755_s16, %s975_s16   ;;  %s711_s15 = sphi %s753_s15, %s974_s15   ;;  %s707_s14 = sphi %s751_s14, %s973_s14   ;;  %s703_s13 = sphi %s749_s13, %s972_s13   ;;  %s699_s12 = sphi %s747_s12, %s971_s12  }
   0xd   : > { %s38_s20 = sadd.s32 1, %s715_s16  ;;  %s47_s21 = sadd.s32 1, %s707_s14 }
   0xe   : > { %p40_p0 = scmp.ge.s32.totalorder %s38_s20, 2  ;;  %p54_p1 = scmp.ne.s32.totalorder %s707_s14, %s703_s13 }
   0xf   : > { %p55_p2 = scmp.eq.s32.totalorder %s719_s17, 0  ;;  %p60_p3 = scmp.ne.s32.totalorder %s703_s13, %s699_s12 }
  0x10   : > { %s977_s20 = smov (%p40_p0, %s38_s20), 0  ;;  %p61_p5 = scmp.eq.s32.totalorder %s450_s18, 0 }
  0x11   : > { %p788_p4 = por %p55_p2, %p54_p1  ;;  %s42_s23 = ssub.s32 %s715_s16, %s977_s20 }
  0x12   : > { %p114_p6 = scmp.eq.s32.totalorder %s450_s18, 1  ;;  %p45_p7 = scmp.eq.s32.totalorder %s42_s23, 0 }
  0x13   : > { %p794_p8 = por %p61_p5, %p60_p3  ;;  %p120_p10 = scmp.eq.s32.totalorder %s451_s19, 1 }
  0x14   : > { %p798_p9 = por %p114_p6, %p54_p1  ;;  %p453_p12 = scmp.ge.s32.totalorder %s719_s17, 2 }
  0x15   : > { %s803_s26 = scalar_select %p45_p7, %s707_s14, %s47_s21  }
  0x16   : > { %p805_p11 = por %p120_p10, %p60_p3  ;;  %p497_p13 = scmp.lt.s32.totalorder %s719_s17, 2 }
  0x17   : > { %s812_s28 = sand.u32 1, %s707_s14   ;;  %s473_s30 = sshll.u32 %s715_s16, 8 }
  0x18   : > { %s454_s29 = sshll.u32 %s812_s28, 4  ;;  %s968_s0 = sld [smem:[#allocation14_spill]] }
  0x19   : > { %s172_s7 = scalar_lea.vmem [#allocation2], %s454_s29  ;;  %p825_p0 = pnand %p497_p13, %p788_p4 }
  0x1a   : > { %s180_s8 = sshll.u32 %s172_s7, 4  ;;  %p460_p1 = scmp.ge.s32.totalorder %s719_s17, 1  ;;  %s181_s8 = int_to_ptr.vmem [resolvable:$true] %s180_s8 }
  0x1b   : > { %s169_s10 = scalar_lea.sflag [#allocation3], %s812_s28  ;;  %p551_p2 = pneg %p825_p0 }
  0x1c   : > { %s562_s11 = scalar_lea.vmem %s181_s8, 256  ;;  %s721_s18 = smov [#allocation2]  }
  0x1d   : > { %p563_p3 = scmp.ne.s32.totalorder %s181_s8, %s562_s11  ;;  %s567_s19 = sshll.u32 %s721_s18, 4  ;;  %s568_s19 = int_to_ptr.vmem [resolvable:$false] %s567_s19 }
  0x1e   : > { %s179_s6 = scalar_lea.hbm %s968_s0, %s473_s30  ;;  %s569_s21 = scalar_lea.vmem %s568_s19, 512 }
  0x1f   : > { %p565_p5 = pnand %p563_p3, %p551_p2  ;;  %p570_p4 = scmp.lt.s32.totalorder %s181_s8, %s568_s19 }
  0x20   : > { %p571_p7 = scmp.lt.s32.totalorder %s569_s21, %s562_s11 }
  0x21   : > { %p566_p6 = pneg %p565_p5 }
  0x22   : > { %p572_p10 = por %p571_p7, %p570_p4 }
  0x24   : > { %p573_p13 = pnand %p572_p10, %p566_p6 }
  0x26   : > { %576 = shalt.err (!%p573_p13)
}
  0x27   : > { %s722_s22 = smov 128   ;;  %s723_s23 = smov 8  }
  0x28   : > { %486 = dma.hbm_to_vmem [thread:$0]  (!%p825_p0), %s179_s6, 256, %s181_s8, %s169_s10, %s722_s22, %s722_s22, %s723_s23  }
  0x29   : > { %p210_p3 = scmp.lt.s32.totalorder %s719_s17, 3  ;;  %s201_s7 = scalar_lea.hbm %s960_s1, %s473_s30 }
  0x2a   : > { %s194_s18 = scalar_lea.vmem [#allocation5], %s454_s29  ;;  %s191_s21 = scalar_lea.sflag [#allocation6], %s812_s28 }
  0x2b   : > { %p846_p5 = pnand %p460_p1, %p210_p3  ;;  %s202_s19 = sshll.u32 %s194_s18, 4  ;;  %s203_s19 = int_to_ptr.vmem [resolvable:$true] %s202_s19 }
  0x2c   : > { %s590_s0 = scalar_lea.vmem %s203_s19, 256  ;;  %s724_s6 = smov [#allocation5]  }
  0x2d   : > { %p591_p6 = scmp.ne.s32.totalorder %s203_s19, %s590_s0  ;;  %s595_s8 = sshll.u32 %s724_s6, 4  ;;  %s596_s8 = int_to_ptr.vmem [resolvable:$false] %s595_s8 }
  0x2e   : > { %s597_s30 = scalar_lea.vmem %s596_s8, 512  ;;  %p598_p10 = scmp.lt.s32.totalorder %s203_s19, %s596_s8 }
  0x2f   : > { %p593_p4 = pnand %p591_p6, %p551_p2  ;;  %p599_p1 = scmp.lt.s32.totalorder %s597_s30, %s590_s0 }
  0x31   : > { %p594_p7 = pneg %p593_p4  ;;  %p600_p13 = por %p599_p1, %p598_p10 }
  0x33   : > { %p601_p3 = pnand %p600_p13, %p594_p7 }
  0x35   : > { %604 = shalt.err (!%p601_p3)
}
  0x36   : > { %489 = dma.hbm_to_vmem [thread:$0]  (!%p825_p0), %s201_s7, 256, %s203_s19, %s191_s21, %s722_s22, %s722_s22, %s723_s23  }
  0x37   : > { %214 = sbr.rel (%p846_p5) target bundleno = 111 (0x6f), region = 28  ;;  %s861_s28 = sand.u32 (!%p846_p5), 1, %s703_s13  }
  0x38   : > { %s461_s29 = sshll.u32 (!%p846_p5), %s861_s28, 4  ;;  %s217_s10 = scalar_lea.sflag (!%p846_p5), [#allocation3], %s861_s28 }
  0x39   : > { %s220_s4 = scalar_lea.vmem (!%p846_p5), [#allocation2], %s461_s29 }
  0x3c   : > { %682 = dma.done.wait (%p794_p8), %s217_s10, 256  }
  0x3d   : > { %684 = vsyncadd (%p794_p8), %s217_s10, 4294967040  ;;  %s226_s0 = scalar_lea.sflag [#allocation6], %s861_s28  ;;  %s229_s9 = scalar_lea.vmem [#allocation5], %s461_s29 }
  0x3e   : > { %686 = dma.done.wait (%p794_p8), %s226_s0, 256  }
  0x3f   : > { %688 = vsyncadd (%p794_p8), %s226_s0, 4294967040  ;;  %s463_s22 = sshll.u32 %s861_s28, 3  ;;  %vm264_vm0 = vcmask 523264   ;;  %v262_v0 = vld [vmem:[%s220_s4] ss:$2 sm:$0xff]  ;;  %s469_s7 = sshll.u32 %s711_s15, 7 }
  0x40   : > { %v263_v1 = vld [vmem:[%s229_s9] ss:$2 sm:$0xff]  ;;  %s254_s23 = scalar_lea.vmem [#allocation7], %s463_s22  ;;  %s261_s5 = scalar_lea.vmem [#allocation8], %s463_s22  ;;  %v465_v2 = vld [vmem:[%s220_s4 + $0x1] ss:$2 sm:$0xff] }
  0x41   : > { %265 = vst.msk [vmem:[%s254_s23] sm:$0xff] %vm264_vm0, %v262_v0  ;;  %266 = vst.msk [vmem:[%s261_s5] sm:$0xff] %vm264_vm0, %v263_v1  ;;  %v466_v3 = vld [vmem:[%s229_s9 + $0x1] ss:$2 sm:$0xff]  ;;  %s297_s11 = sshll.u32 %s254_s23, 4  ;;  %s311_s24 = sshll.u32 %s261_s5, 4  ;;  %s883_s11 = int_to_ptr.vmem [resolvable:$true] %s297_s11  ;;  %s890_s24 = int_to_ptr.vmem [resolvable:$true] %s311_s24 }
  0x42   : > { %s881_s21 = scalar_lea.hbm %s961_s2, %s469_s7  ;;  %s888_s15 = scalar_lea.hbm %s962_s3, %s469_s7 }
  0x43   : > { %s278_s30 = scalar_lea.sflag [#allocation4], %s861_s28  ;;  %s605_s29 = scalar_lea.vmem %s883_s11, 128 }
  0x44   : > { %p606_p8 = scmp.ne.s32.totalorder %s883_s11, %s605_s29  ;;  %s725_s10 = smov [#allocation7]  }
  0x45   : > { %s609_s4 = sshll.u32 %s725_s10, 4  ;;  %s610_s4 = int_to_ptr.vmem [resolvable:$false] %s609_s4 }
  0x46   : > { %p607_p0 = pnand %p606_p8, %p798_p9  ;;  %s611_s0 = scalar_lea.vmem %s610_s4, 256 }
  0x47   : > { %p612_p5 = scmp.lt.s32.totalorder %s883_s11, %s610_s4  ;;  %p613_p6 = scmp.lt.s32.totalorder %s611_s0, %s605_s29 }
  0x48   : > { %v271_v4 = vld [vmem:[%s254_s23] sm:$0xff]  ;;  %v274_v5 = vld [vmem:[%s261_s5] sm:$0xff]  ;;  %p608_p2 = pneg %p607_p0 }
  0x49   : > { %v272_v6 = vmax.f32 %v271_v4, %v465_v2  ;;  %v275_v7 = vmax.f32 %v274_v5, %v466_v3  ;;  %p614_p4 = por %p613_p6, %p612_p5 }
  0x4b   : > { %273 = vst.msk [vmem:[%s254_s23] sm:$0xff] %vm264_vm0, %v272_v6  ;;  %276 = vst.msk [vmem:[%s261_s5] sm:$0xff] %vm264_vm0, %v275_v7  ;;  %p615_p7 = pnand %p614_p4, %p608_p2 }
  0x4d   : > { %618 = shalt.err (!%p615_p7)
}
  0x4e   : > { %s619_s9 = scalar_lea.hbm %s881_s21, 128  ;;  %s623_s5 = scalar_lea.hbm %s961_s2, 256 }
  0x4f   : > { %p620_p10 = scmp.ne.s32.totalorder %s881_s21, %s619_s9  ;;  %p624_p3 = scmp.lt.s32.totalorder %s881_s21, %s961_s2 }
  0x50   : > { %p625_p8 = scmp.lt.s32.totalorder %s623_s5, %s619_s9 }
  0x51   : > { %p621_p1 = pnand %p620_p10, %p798_p9 }
  0x52   : > { %p626_p0 = por %p625_p8, %p624_p3 }
  0x53   : > { %p622_p13 = pneg %p621_p1 }
  0x55   : > { %p627_p2 = pnand %p626_p0, %p622_p13 }
  0x57   : > { %630 = shalt.err (!%p627_p2)
}
  0x58   : > { %479 = dma.vmem_to_hbm [thread:$0]  (%p798_p9), %s883_s11, 128, %s881_s21, %s278_s30  }
  0x59   : > { %s283_s19 = scalar_lea.sflag [#allocation9], %s861_s28  ;;  %s631_s6 = scalar_lea.vmem %s890_s24, 128 }
  0x5a   : > { %p632_p5 = scmp.ne.s32.totalorder %s890_s24, %s631_s6  ;;  %s726_s8 = smov [#allocation8]  }
  0x5b   : > { %s635_s29 = sshll.u32 %s726_s8, 4  ;;  %s636_s29 = int_to_ptr.vmem [resolvable:$false] %s635_s29 }
  0x5c   : > { %p633_p6 = pnand %p632_p5, %p798_p9  ;;  %s637_s10 = scalar_lea.vmem %s636_s29, 256 }
  0x5d   : > { %p638_p7 = scmp.lt.s32.totalorder %s890_s24, %s636_s29  ;;  %p639_p10 = scmp.lt.s32.totalorder %s637_s10, %s631_s6 }
  0x5e   : > { %p634_p4 = pneg %p633_p6 }
  0x5f   : > { %p640_p1 = por %p639_p10, %p638_p7 }
  0x61   : > { %p641_p13 = pnand %p640_p1, %p634_p4 }
  0x63   : > { %644 = shalt.err (!%p641_p13)
}
  0x64   : > { %s645_s11 = scalar_lea.hbm %s888_s15, 128  ;;  %s649_s30 = scalar_lea.hbm %s962_s3, 256 }
  0x65   : > { %p646_p3 = scmp.ne.s32.totalorder %s888_s15, %s645_s11  ;;  %p650_p2 = scmp.lt.s32.totalorder %s888_s15, %s962_s3 }
  0x66   : > { %p651_p5 = scmp.lt.s32.totalorder %s649_s30, %s645_s11 }
  0x67   : > { %p647_p8 = pnand %p646_p3, %p798_p9 }
  0x68   : > { %p652_p6 = por %p651_p5, %p650_p2 }
  0x69   : > { %p648_p0 = pneg %p647_p8 }
  0x6b   : > { %p653_p4 = pnand %p652_p6, %p648_p0 }
  0x6d   : > { %656 = shalt.err (!%p653_p4)
}
  0x6e   : > { %480 = dma.vmem_to_hbm [thread:$0]  (%p798_p9), %s890_s24, 128, %s888_s15, %s283_s19  }
  0x6f PF: > { %s323_s9 = sand.u32 1, %s699_s12   ;;  %p491_p7 = pnand %p453_p12, %p805_p11 }
  0x70   : > { %s324_s22 = scalar_lea.sflag [#allocation4], %s323_s9 }
  0x71   : > { %p492_p10 = pneg %p491_p7 }
  0x73   : > { %690 = dma.done.wait (%p492_p10), %s324_s22, 128  }
  0x74   : > { %692 = vsyncadd (%p492_p10), %s324_s22, 4294967168  ;;  %s333_s23 = scalar_lea.sflag [#allocation9], %s323_s9 }
  0x75   : > { %694 = dma.done.wait (%p492_p10), %s333_s23, 128  }
  0x76   : > { %696 = vsyncadd (%p492_p10), %s333_s23, 4294967168  ;;  %s26_s17 = sadd.s32 1, %s719_s17   ;;  %s971_s12 = smov %s703_s13 }
  0x77   : > { %p23_p1 = scmp.ge.s32.totalorder %s26_s17, 4   ;;  %s972_s13 = smov %s707_s14 }
  0x78   : > { %s973_s14 = smov %s803_s26  ;;  %s974_s15 = smov %s715_s16 }
  0x79   : > { %s975_s16 = smov %s977_s20  ;;  %25 = sbr.rel (!%p23_p1) target bundleno = 12 (0xc), region = 105 }
  0x7e   :  { %338 = vsyncpa [#allocation3], 1 }
  0x7f   :  { %340 = vsyncpa [#allocation3 + $0x1], 1 }
  0x80   :  { %341 = vsyncpa [#allocation6], 1 }
  0x81   :  { %343 = vsyncpa [#allocation6 + $0x1], 1 }
  0x82   :  { %344 = vsyncpa [#allocation4], 1 }
  0x83   :  { %346 = vsyncpa [#allocation4 + $0x1], 1 }
  0x84   :  { %347 = vsyncpa [#allocation9], 1 }
  0x85   :  { %349 = vsyncpa [#allocation9 + $0x1], 1 }

</bundles_post_ra>
